<compile_context>
chip_gen: v6e
topology: v6e:2x2x1
jax: 0.10.0
libtpu: 0.0.40
codegen_flags: <defaults>
</compile_context>

<pallas_src>
import jax
import jax.numpy as jnp
import numpy as np
from jax import lax
from jax.experimental import pallas as pl
from jax.experimental.pallas import tpu as pltpu


def _make_kernel(num_experts, batch, num_classes, *,
                 base_diversity_temperature, additional_diversity_factor,
                 base_loss_factor, ride_loss_factor,
                 additional_distill_loss_factor, distill_temperature):
    Td = float(base_diversity_temperature)
    T = float(distill_temperature)
    inv_Td = 1.0 / Td
    inv_T = 1.0 / T
    inv_B = 1.0 / float(batch)
    # per_cls_weights_diversity is None in this configuration, so
    # temperature_mean == base_diversity_temperature.
    temp_mean = Td
    div_scale = float(additional_diversity_factor) * temp_mean * temp_mean * inv_B
    ce_scale = float(base_loss_factor) * inv_B
    distill_scale = T * T * inv_B
    ride_f = float(ride_loss_factor)
    dist_f = float(additional_distill_loss_factor)
    E_f = float(num_experts)

    def kernel(tgt_ref, student_ref, teacher_ref, expert_ref, out_ref,
               p_div_ref, plogp_ref, distill_ref, acc_ref):
        e = pl.program_id(0)

        # ---------- expert-independent work: computed once, kept in scratch ----------
        @pl.when(e == 0)
        def _():
            s = student_ref[...]                                  # (B, C)
            s_d = s * inv_Td
            m_s = jnp.max(s_d, axis=1, keepdims=True)
            ex_s = jnp.exp(s_d - m_s)
            den_s = jnp.sum(ex_s, axis=1, keepdims=True)
            log_den_s = jnp.log(den_s)
            p_s = ex_s * pl.reciprocal(den_s)                     # softmax(student / Td)
            log_p_s = (s_d - m_s) - log_den_s                     # log_softmax(student / Td)
            p_div_ref[...] = p_s
            plogp_ref[...] = jnp.sum(
                jnp.sum(p_s * log_p_s, axis=1, keepdims=True), axis=0, keepdims=True)

            # distillation KL (same value every outer iteration -> compute once)
            if T == Td:
                log_q_s = log_p_s                                 # reuse student stats
            else:
                s_t = s * inv_T
                m_st = jnp.max(s_t, axis=1, keepdims=True)
                lse_st = jnp.log(jnp.sum(jnp.exp(s_t - m_st), axis=1,
                                         keepdims=True)) + m_st
                log_q_s = s_t - lse_st
            t = teacher_ref[...]
            t_s = t * inv_T
            m_t = jnp.max(t_s, axis=1, keepdims=True)
            ex_t = jnp.exp(t_s - m_t)
            den_t = jnp.sum(ex_t, axis=1, keepdims=True)
            p_t = ex_t * pl.reciprocal(den_t)                     # softmax(teacher / T)
            log_p_t = (t_s - m_t) - jnp.log(den_t)
            kl = jnp.sum(jnp.sum(p_t * (log_p_t - log_q_s), axis=1, keepdims=True),
                         axis=0, keepdims=True)
            distill_ref[...] = distill_scale * kl
            acc_ref[...] = jnp.zeros_like(acc_ref)

        # ---------- per-expert RIDE contribution ----------
        x = expert_ref[...]                                       # (B, C)
        m_x = jnp.max(x, axis=1, keepdims=True)
        ex_x = jnp.exp(x - m_x)
        den_x = jnp.sum(ex_x, axis=1, keepdims=True)
        lse = jnp.log(den_x) + m_x                                # (B, 1)

        # cross entropy (mean over batch, no class weights)
        col = lax.broadcasted_iota(jnp.int32, x.shape, 1)
        onehot = col == tgt_ref[...]                              # (B, C) bool
        tgt_logit = jnp.sum(jnp.where(onehot, x, 0.0), axis=1, keepdims=True)
        ce_sum = jnp.sum(lse - tgt_logit, axis=0, keepdims=True)  # (1, 1)

        # diversity KL: sum p*(log p - log q) = plogp - sum(p * log_softmax(x/Td))
        if Td == 1.0:
            q_log = x - lse                                       # reuse CE log-sum-exp
        else:
            x_d = x * inv_Td
            m_d = jnp.max(x_d, axis=1, keepdims=True)
            lse_d = jnp.log(jnp.sum(jnp.exp(x_d - m_d), axis=1, keepdims=True)) + m_d
            q_log = x_d - lse_d
        cross = jnp.sum(jnp.sum(p_div_ref[...] * q_log, axis=1, keepdims=True),
                        axis=0, keepdims=True)                    # (1, 1)

        ride_e = ce_scale * ce_sum + div_scale * (plogp_ref[...] - cross)
        acc_ref[...] = acc_ref[...] + ride_e

        @pl.when(e == pl.num_programs(0) - 1)
        def _():
            out_ref[...] = E_f * (ride_f * acc_ref[...] + dist_f * distill_ref[...])

    return kernel


def ride_loss_with_distill(student, teacher, expert_logits, target, *,
                           base_diversity_temperature=1.0,
                           additional_diversity_factor=-0.2,
                           base_loss_factor=1.0,
                           ride_loss_factor=1.0,
                           additional_distill_loss_factor=1.0,
                           distill_temperature=1.0):
    B, C = student.shape
    E = expert_logits.shape[0]
    kernel = _make_kernel(
        E, B, C,
        base_diversity_temperature=base_diversity_temperature,
        additional_diversity_factor=additional_diversity_factor,
        base_loss_factor=base_loss_factor,
        ride_loss_factor=ride_loss_factor,
        additional_distill_loss_factor=additional_distill_loss_factor,
        distill_temperature=distill_temperature)

    out = pl.pallas_call(
        kernel,
        out_shape=jax.ShapeDtypeStruct((1, 1), jnp.float32),
        grid=(E,),
        in_specs=[
            pl.BlockSpec((B, 1), lambda e: (0, 0)),            # target column (int32)
            pl.BlockSpec((B, C), lambda e: (0, 0)),            # student
            pl.BlockSpec((B, C), lambda e: (0, 0)),            # teacher
            pl.BlockSpec((None, B, C), lambda e: (e, 0, 0)),   # expert e (squeezed)
        ],
        out_specs=pl.BlockSpec((1, 1), lambda e: (0, 0)),
        scratch_shapes=[
            pltpu.VMEM((B, C), jnp.float32),   # softmax(student / Td)
            pltpu.VMEM((1, 1), jnp.float32),   # sum p * log p
            pltpu.VMEM((1, 1), jnp.float32),   # distillation term
            pltpu.VMEM((1, 1), jnp.float32),   # RIDE-loss accumulator
        ],
        compiler_params=pltpu.CompilerParams(
            dimension_semantics=("arbitrary",)),
    )(target.astype(jnp.int32).reshape(B, 1),
      student.astype(jnp.float32),
      teacher.astype(jnp.float32),
      expert_logits.astype(jnp.float32))
    return out[0, 0]


def ride_loss_with_distill_ref(student, teacher, expert_logits, target, *,
                               base_diversity_temperature=1.0,
                               additional_diversity_factor=-0.2,
                               base_loss_factor=1.0,
                               ride_loss_factor=1.0,
                               additional_distill_loss_factor=1.0,
                               distill_temperature=1.0):
    """Pure-JAX reference mirroring the PyTorch forward (default config)."""
    B, _ = student.shape
    E = expert_logits.shape[0]
    Td = base_diversity_temperature
    T = distill_temperature

    def cross_entropy(logits, tgt):
        logp = jax.nn.log_softmax(logits, axis=1)
        nll = -jnp.take_along_axis(logp, tgt[:, None], axis=1)[:, 0]
        return jnp.mean(nll)

    def kl_batchmean(log_q, p):
        return jnp.sum(p * (jnp.log(p) - log_q)) / B

    mean_dist = jax.nn.softmax(student / Td, axis=1)
    ride_total = 0.0
    for e in range(E):
        le = expert_logits[e]
        ride_total = ride_total + base_loss_factor * cross_entropy(le, target)
        out_dist = jax.nn.log_softmax(le / Td, axis=1)
        ride_total = ride_total + (additional_diversity_factor * Td * Td
                                   * kl_batchmean(out_dist, mean_dist))

    s_dist = jax.nn.log_softmax(student / T, axis=1)
    t_dist = jax.nn.softmax(teacher / T, axis=1)
    distill = T * T * kl_batchmean(s_dist, t_dist)

    loss = 0.0
    for _ in range(E):
        loss = loss + ride_loss_factor * ride_total
        loss = loss + additional_distill_loss_factor * distill
    return loss


if __name__ == "__main__":
    key = jax.random.PRNGKey(0)
    k_s, k_t, k_e, k_y = jax.random.split(key, 4)
    B, C, E = 8, 16, 3
    student = jax.random.normal(k_s, (B, C), dtype=jnp.float32)
    teacher = jax.random.normal(k_t, (B, C), dtype=jnp.float32)
    experts = jax.random.normal(k_e, (E, B, C), dtype=jnp.float32)
    target = jax.random.randint(k_y, (B,), 0, C, dtype=jnp.int32)

    loss = jax.block_until_ready(
        ride_loss_with_distill(student, teacher, experts, target))
    ref = jax.block_until_ready(
        ride_loss_with_distill_ref(student, teacher, experts, target))

    np.testing.assert_allclose(np.asarray(loss), np.asarray(ref),
                               rtol=1e-5, atol=1e-5)
    print("KERNEL_OK")
</pallas_src>

<mosaic_0001>
module attributes {stable_mosaic.version = 11 : i64} {
  func.func @kernel(%arg0: i32, %arg1: memref<8x1xi32, #tpu.memory_space<vmem>>, %arg2: memref<8x16xf32, #tpu.memory_space<vmem>>, %arg3: memref<8x16xf32, #tpu.memory_space<vmem>>, %arg4: memref<1x8x16xf32, #tpu.memory_space<vmem>>, %arg5: memref<1x1xf32, #tpu.memory_space<vmem>>, %arg6: memref<8x16xf32, #tpu.memory_space<vmem>>, %arg7: memref<1x1xf32, #tpu.memory_space<vmem>>, %arg8: memref<1x1xf32, #tpu.memory_space<vmem>>, %arg9: memref<1x1xf32, #tpu.memory_space<vmem>>) attributes {dimension_semantics = [#tpu.dimension_semantics<arbitrary>], iteration_bounds = array<i64: 3>, scalar_prefetch = 0 : i64, scratch_operands = 4 : i64, tpu.core_type = #tpu.core_type<tc>, window_params = [{pipeline_mode = #tpu.pipeline_mode<synchronous>, transform_indices = @transform_0, window_bounds = array<i64: 8, 1>}, {pipeline_mode = #tpu.pipeline_mode<synchronous>, transform_indices = @transform_1, window_bounds = array<i64: 8, 16>}, {pipeline_mode = #tpu.pipeline_mode<synchronous>, transform_indices = @transform_2, window_bounds = array<i64: 8, 16>}, {transform_indices = @transform_3, window_bounds = array<i64: 1, 8, 16>}, {pipeline_mode = #tpu.pipeline_mode<synchronous>, transform_indices = @transform_4, window_bounds = array<i64: 1, 1>}]} {
    %c0_i32 = arith.constant 0 : i32
    %0 = arith.cmpi eq, %arg0, %c0_i32 : i32
    %1 = arith.extui %0 : i1 to i32
    %c0_i32_0 = arith.constant 0 : i32
    %2 = arith.cmpi ne, %1, %c0_i32_0 : i32
    scf.if %2 {
      %c0_22 = arith.constant 0 : index
      %c0_23 = arith.constant 0 : index
      %46 = vector.load %arg2[%c0_22, %c0_23] : memref<8x16xf32, #tpu.memory_space<vmem>>, vector<8x16xf32>
      %cst_24 = arith.constant 1.000000e+00 : f32
      %47 = vector.broadcast %cst_24 : f32 to vector<8x16xf32>
      %48 = arith.mulf %46, %47 : vector<8x16xf32>
      %cst_25 = arith.constant dense<0xFF800000> : vector<8xf32>
      %49 = vector.multi_reduction <maximumf>, %48, %cst_25 [1] : vector<8x16xf32> to vector<8xf32>
      %50 = vector.shape_cast %49 : vector<8xf32> to vector<8x1xf32>
      %51 = vector.broadcast %50 : vector<8x1xf32> to vector<8x16xf32>
      %52 = arith.subf %48, %51 : vector<8x16xf32>
      %53 = math.exp %52 : vector<8x16xf32>
      %cst_26 = arith.constant dense<0.000000e+00> : vector<8xf32>
      %54 = vector.multi_reduction <add>, %53, %cst_26 [1] : vector<8x16xf32> to vector<8xf32>
      %55 = vector.shape_cast %54 : vector<8xf32> to vector<8x1xf32>
      %56 = math.log %55 : vector<8x1xf32>
      %57 = tpu.reciprocal %55 : vector<8x1xf32> -> vector<8x1xf32>
      %58 = vector.broadcast %57 : vector<8x1xf32> to vector<8x16xf32>
      %59 = arith.mulf %53, %58 : vector<8x16xf32>
      %60 = vector.broadcast %50 : vector<8x1xf32> to vector<8x16xf32>
      %61 = arith.subf %48, %60 : vector<8x16xf32>
      %62 = vector.broadcast %56 : vector<8x1xf32> to vector<8x16xf32>
      %63 = arith.subf %61, %62 : vector<8x16xf32>
      %c0_27 = arith.constant 0 : index
      %c0_28 = arith.constant 0 : index
      %64 = vector.load %arg6[%c0_27, %c0_28] : memref<8x16xf32, #tpu.memory_space<vmem>>, vector<8x16xf32>
      tpu.vector_store %arg6[%c0_27, %c0_28], %59 {strides = array<i32>} : memref<8x16xf32, #tpu.memory_space<vmem>>, vector<8x16xf32>,
      %65 = arith.mulf %59, %63 : vector<8x16xf32>
      %cst_29 = arith.constant dense<0.000000e+00> : vector<8xf32>
      %66 = vector.multi_reduction <add>, %65, %cst_29 [1] : vector<8x16xf32> to vector<8xf32>
      %67 = vector.shape_cast %66 : vector<8xf32> to vector<8x1xf32>
      %cst_30 = arith.constant dense<0.000000e+00> : vector<1xf32>
      %68 = vector.multi_reduction <add>, %67, %cst_30 [0] : vector<8x1xf32> to vector<1xf32>
      %69 = vector.shape_cast %68 : vector<1xf32> to vector<1x1xf32>
      %c0_31 = arith.constant 0 : index
      %c0_32 = arith.constant 0 : index
      %70 = vector.load %arg7[%c0_31, %c0_32] : memref<1x1xf32, #tpu.memory_space<vmem>>, vector<1x1xf32>
      tpu.vector_store %arg7[%c0_31, %c0_32], %69 {strides = array<i32>} : memref<1x1xf32, #tpu.memory_space<vmem>>, vector<1x1xf32>,
      %c0_33 = arith.constant 0 : index
      %c0_34 = arith.constant 0 : index
      %71 = vector.load %arg3[%c0_33, %c0_34] : memref<8x16xf32, #tpu.memory_space<vmem>>, vector<8x16xf32>
      %cst_35 = arith.constant 1.000000e+00 : f32
      %72 = vector.broadcast %cst_35 : f32 to vector<8x16xf32>
      %73 = arith.mulf %71, %72 : vector<8x16xf32>
      %cst_36 = arith.constant dense<0xFF800000> : vector<8xf32>
      %74 = vector.multi_reduction <maximumf>, %73, %cst_36 [1] : vector<8x16xf32> to vector<8xf32>
      %75 = vector.shape_cast %74 : vector<8xf32> to vector<8x1xf32>
      %76 = vector.broadcast %75 : vector<8x1xf32> to vector<8x16xf32>
      %77 = arith.subf %73, %76 : vector<8x16xf32>
      %78 = math.exp %77 : vector<8x16xf32>
      %cst_37 = arith.constant dense<0.000000e+00> : vector<8xf32>
      %79 = vector.multi_reduction <add>, %78, %cst_37 [1] : vector<8x16xf32> to vector<8xf32>
      %80 = vector.shape_cast %79 : vector<8xf32> to vector<8x1xf32>
      %81 = tpu.reciprocal %80 : vector<8x1xf32> -> vector<8x1xf32>
      %82 = vector.broadcast %81 : vector<8x1xf32> to vector<8x16xf32>
      %83 = arith.mulf %78, %82 : vector<8x16xf32>
      %84 = vector.broadcast %75 : vector<8x1xf32> to vector<8x16xf32>
      %85 = arith.subf %73, %84 : vector<8x16xf32>
      %86 = math.log %80 : vector<8x1xf32>
      %87 = vector.broadcast %86 : vector<8x1xf32> to vector<8x16xf32>
      %88 = arith.subf %85, %87 : vector<8x16xf32>
      %89 = arith.subf %88, %63 : vector<8x16xf32>
      %90 = arith.mulf %83, %89 : vector<8x16xf32>
      %cst_38 = arith.constant dense<0.000000e+00> : vector<8xf32>
      %91 = vector.multi_reduction <add>, %90, %cst_38 [1] : vector<8x16xf32> to vector<8xf32>
      %92 = vector.shape_cast %91 : vector<8xf32> to vector<8x1xf32>
      %cst_39 = arith.constant dense<0.000000e+00> : vector<1xf32>
      %93 = vector.multi_reduction <add>, %92, %cst_39 [0] : vector<8x1xf32> to vector<1xf32>
      %94 = vector.shape_cast %93 : vector<1xf32> to vector<1x1xf32>
      %cst_40 = arith.constant 1.250000e-01 : f32
      %95 = vector.broadcast %cst_40 : f32 to vector<1x1xf32>
      %96 = arith.mulf %95, %94 : vector<1x1xf32>
      %c0_41 = arith.constant 0 : index
      %c0_42 = arith.constant 0 : index
      %97 = vector.load %arg8[%c0_41, %c0_42] : memref<1x1xf32, #tpu.memory_space<vmem>>, vector<1x1xf32>
      tpu.vector_store %arg8[%c0_41, %c0_42], %96 {strides = array<i32>} : memref<1x1xf32, #tpu.memory_space<vmem>>, vector<1x1xf32>,
      %cst_43 = arith.constant 0.000000e+00 : f32
      %98 = vector.broadcast %cst_43 : f32 to vector<1x1xf32>
      %c0_44 = arith.constant 0 : index
      %c0_45 = arith.constant 0 : index
      %99 = vector.load %arg9[%c0_44, %c0_45] : memref<1x1xf32, #tpu.memory_space<vmem>>, vector<1x1xf32>
      tpu.vector_store %arg9[%c0_44, %c0_45], %98 {strides = array<i32>} : memref<1x1xf32, #tpu.memory_space<vmem>>, vector<1x1xf32>,
    } else {
    }
    %c0 = arith.constant 0 : index
    %c0_1 = arith.constant 0 : index
    %c0_2 = arith.constant 0 : index
    %3 = vector.load %arg4[%c0, %c0_1, %c0_2] : memref<1x8x16xf32, #tpu.memory_space<vmem>>, vector<1x8x16xf32>
    %4 = vector.shape_cast %3 : vector<1x8x16xf32> to vector<8x16xf32>
    %cst = arith.constant dense<0xFF800000> : vector<8xf32>
    %5 = vector.multi_reduction <maximumf>, %4, %cst [1] : vector<8x16xf32> to vector<8xf32>
    %6 = vector.shape_cast %5 : vector<8xf32> to vector<8x1xf32>
    %7 = vector.broadcast %6 : vector<8x1xf32> to vector<8x16xf32>
    %8 = arith.subf %4, %7 : vector<8x16xf32>
    %9 = math.exp %8 : vector<8x16xf32>
    %cst_3 = arith.constant dense<0.000000e+00> : vector<8xf32>
    %10 = vector.multi_reduction <add>, %9, %cst_3 [1] : vector<8x16xf32> to vector<8xf32>
    %11 = vector.shape_cast %10 : vector<8xf32> to vector<8x1xf32>
    %12 = math.log %11 : vector<8x1xf32>
    %13 = arith.addf %12, %6 : vector<8x1xf32>
    %14 = tpu.iota {dimensions = array<i32: 1>} : vector<8x16xi32>
    %c0_4 = arith.constant 0 : index
    %c0_5 = arith.constant 0 : index
    %15 = vector.load %arg1[%c0_4, %c0_5] : memref<8x1xi32, #tpu.memory_space<vmem>>, vector<8x1xi32>
    %16 = vector.broadcast %15 : vector<8x1xi32> to vector<8x16xi32>
    %17 = arith.cmpi eq, %14, %16 : vector<8x16xi32>
    %cst_6 = arith.constant 0.000000e+00 : f32
    %18 = vector.broadcast %cst_6 : f32 to vector<8x16xf32>
    %19 = arith.select %17, %4, %18 : vector<8x16xi1>, vector<8x16xf32>
    %cst_7 = arith.constant dense<0.000000e+00> : vector<8xf32>
    %20 = vector.multi_reduction <add>, %19, %cst_7 [1] : vector<8x16xf32> to vector<8xf32>
    %21 = vector.shape_cast %20 : vector<8xf32> to vector<8x1xf32>
    %22 = arith.subf %13, %21 : vector<8x1xf32>
    %cst_8 = arith.constant dense<0.000000e+00> : vector<1xf32>
    %23 = vector.multi_reduction <add>, %22, %cst_8 [0] : vector<8x1xf32> to vector<1xf32>
    %24 = vector.shape_cast %23 : vector<1xf32> to vector<1x1xf32>
    %25 = vector.broadcast %13 : vector<8x1xf32> to vector<8x16xf32>
    %26 = arith.subf %4, %25 : vector<8x16xf32>
    %c0_9 = arith.constant 0 : index
    %c0_10 = arith.constant 0 : index
    %27 = vector.load %arg6[%c0_9, %c0_10] : memref<8x16xf32, #tpu.memory_space<vmem>>, vector<8x16xf32>
    %28 = arith.mulf %27, %26 : vector<8x16xf32>
    %cst_11 = arith.constant dense<0.000000e+00> : vector<8xf32>
    %29 = vector.multi_reduction <add>, %28, %cst_11 [1] : vector<8x16xf32> to vector<8xf32>
    %30 = vector.shape_cast %29 : vector<8xf32> to vector<8x1xf32>
    %cst_12 = arith.constant dense<0.000000e+00> : vector<1xf32>
    %31 = vector.multi_reduction <add>, %30, %cst_12 [0] : vector<8x1xf32> to vector<1xf32>
    %32 = vector.shape_cast %31 : vector<1xf32> to vector<1x1xf32>
    %cst_13 = arith.constant 1.250000e-01 : f32
    %33 = vector.broadcast %cst_13 : f32 to vector<1x1xf32>
    %34 = arith.mulf %33, %24 : vector<1x1xf32>
    %c0_14 = arith.constant 0 : index
    %c0_15 = arith.constant 0 : index
    %35 = vector.load %arg7[%c0_14, %c0_15] : memref<1x1xf32, #tpu.memory_space<vmem>>, vector<1x1xf32>
    %36 = arith.subf %35, %32 : vector<1x1xf32>
    %cst_16 = arith.constant -2.500000e-02 : f32
    %37 = vector.broadcast %cst_16 : f32 to vector<1x1xf32>
    %38 = arith.mulf %37, %36 : vector<1x1xf32>
    %39 = arith.addf %34, %38 : vector<1x1xf32>
    %c0_17 = arith.constant 0 : index
    %c0_18 = arith.constant 0 : index
    %40 = vector.load %arg9[%c0_17, %c0_18] : memref<1x1xf32, #tpu.memory_space<vmem>>, vector<1x1xf32>
    %41 = arith.addf %40, %39 : vector<1x1xf32>
    %c0_19 = arith.constant 0 : index
    %c0_20 = arith.constant 0 : index
    %42 = vector.load %arg9[%c0_19, %c0_20] : memref<1x1xf32, #tpu.memory_space<vmem>>, vector<1x1xf32>
    tpu.vector_store %arg9[%c0_19, %c0_20], %41 {strides = array<i32>} : memref<1x1xf32, #tpu.memory_space<vmem>>, vector<1x1xf32>,
    %c2_i32 = arith.constant 2 : i32
    %43 = arith.cmpi eq, %arg0, %c2_i32 : i32
    %44 = arith.extui %43 : i1 to i32
    %c0_i32_21 = arith.constant 0 : i32
    %45 = arith.cmpi ne, %44, %c0_i32_21 : i32
    scf.if %45 {
      %c0_22 = arith.constant 0 : index
      %c0_23 = arith.constant 0 : index
      %46 = vector.load %arg9[%c0_22, %c0_23] : memref<1x1xf32, #tpu.memory_space<vmem>>, vector<1x1xf32>
      %cst_24 = arith.constant 1.000000e+00 : f32
      %47 = vector.broadcast %cst_24 : f32 to vector<1x1xf32>
      %48 = arith.mulf %47, %46 : vector<1x1xf32>
      %c0_25 = arith.constant 0 : index
      %c0_26 = arith.constant 0 : index
      %49 = vector.load %arg8[%c0_25, %c0_26] : memref<1x1xf32, #tpu.memory_space<vmem>>, vector<1x1xf32>
      %cst_27 = arith.constant 1.000000e+00 : f32
      %50 = vector.broadcast %cst_27 : f32 to vector<1x1xf32>
      %51 = arith.mulf %50, %49 : vector<1x1xf32>
      %52 = arith.addf %48, %51 : vector<1x1xf32>
      %cst_28 = arith.constant 3.000000e+00 : f32
      %53 = vector.broadcast %cst_28 : f32 to vector<1x1xf32>
      %54 = arith.mulf %53, %52 : vector<1x1xf32>
      %c0_29 = arith.constant 0 : index
      %c0_30 = arith.constant 0 : index
      %55 = vector.load %arg5[%c0_29, %c0_30] : memref<1x1xf32, #tpu.memory_space<vmem>>, vector<1x1xf32>
      tpu.vector_store %arg5[%c0_29, %c0_30], %54 {strides = array<i32>} : memref<1x1xf32, #tpu.memory_space<vmem>>, vector<1x1xf32>,
    } else {
    }
    return
  }
  func.func @transform_0(%arg0: i32) -> (i32, i32) {
    %c0_i32 = arith.constant 0 : i32
    %c0_i32_0 = arith.constant 0 : i32
    %c0_i32_1 = arith.constant 0 : i32
    return %c0_i32, %c0_i32_0 : i32, i32
  }
  func.func @transform_1(%arg0: i32) -> (i32, i32) {
    %c0_i32 = arith.constant 0 : i32
    %c0_i32_0 = arith.constant 0 : i32
    %c0_i32_1 = arith.constant 0 : i32
    return %c0_i32, %c0_i32_0 : i32, i32
  }
  func.func @transform_2(%arg0: i32) -> (i32, i32) {
    %c0_i32 = arith.constant 0 : i32
    %c0_i32_0 = arith.constant 0 : i32
    %c0_i32_1 = arith.constant 0 : i32
    return %c0_i32, %c0_i32_0 : i32, i32
  }
  func.func @transform_3(%arg0: i32) -> (i32, i32, i32) {
    %c0_i32 = arith.constant 0 : i32
    %c0_i32_0 = arith.constant 0 : i32
    %c0_i32_1 = arith.constant 0 : i32
    return %arg0, %c0_i32, %c0_i32_0 : i32, i32, i32
  }
  func.func @transform_4(%arg0: i32) -> (i32, i32) {
    %c0_i32 = arith.constant 0 : i32
    %c0_i32_0 = arith.constant 0 : i32
    %c0_i32_1 = arith.constant 0 : i32
    return %c0_i32, %c0_i32_0 : i32, i32
  }
}

</mosaic_0001>

<bundles_post_ra>
// kernel: tpu_custom_call.1
= control target key start
LH: loop header
LB: loop body
LE: loop exit
PB: predicated region body
PF: predicated region fallthrough
CT: control target
= control target key end

     0   :  { %9 = vsyncpa [#allocation7], 0  ;;  %s813_s0 = inlined_call_operand.vmem [shape: s32[8,1], index: 0, kind: input, shape index: {}]   ;;  %s814_s1 = inlined_call_operand.vmem [shape: f32[8,16], index: 1, kind: input, shape index: {}]   ;;  %s815_s2 = inlined_call_operand.hbm [shape: f32[8,16], index: 2, kind: input, shape index: {}]   ;;  %s816_s3 = inlined_call_operand.hbm [shape: f32[3,8,16], index: 3, kind: input, shape index: {}]   ;;  %s817_s4 = inlined_call_operand.hbm [shape: f32[1,1], index: 4, kind: output, shape index: {}]  }
   0x1   :  { %10 = vsyncpa [#allocation10], 0 }
   0x2   :  { %12 = vsyncpa [#allocation10 + $0x1], 0 }
   0x3   :  { %13 = vsyncpa [#allocation8], 0  ;;  %s651_s15 = smov 0   ;;  %s653_s16 = smov 0  }
   0x4   :  { %s655_s17 = smov 0   ;;  %s657_s18 = smov 0  }
   0x5 LB: > { %s670_s19 = sadd.s32 4294967295, %s619_s18   ;;  %p102_p0 = scmp.ne.s32.totalorder %s611_s16, %s607_s15  ;;  %s619_s18 = sphi %s657_s18, %s834_s18   ;;  %s615_s17 = sphi %s655_s17, %s833_s17   ;;  %s611_s16 = sphi %s653_s16, %s832_s16   ;;  %s607_s15 = sphi %s651_s15, %s831_s15  }
   0x6   : > { %p818_p1 = scmp.eq.s32.totalorder %s670_s19, 0  ;;  %p408_p2 = scmp.ge.s32.totalorder %s619_s18, 1 }
   0x7   : > { %p134_p3 = scmp.lt.s32.totalorder %s619_s18, 4  ;;  %s621_s22 = smov [#allocation6]  }
   0x8   : > { %p679_p5 = por %p818_p1, %p102_p0  ;;  %s153_s23 = sshll.u32 %s621_s22, 4  ;;  %s154_s23 = int_to_ptr.vmem [resolvable:$true] %s153_s23 }
   0x9   : > { %p683_p6 = pnand %p408_p2, %p134_p3  ;;  %s690_s24 = sadd.s32 1, %s619_s18  }
   0xa   : > { %s821_s20 = scalar_select %p679_p5, 1, 0 }
   0xb   : > { %s822_s21 = scalar_select %p683_p6, 1, 0 }
   0xc   : > { %p432_p7 = pneg %p683_p6  ;;  %s86_s26 = ssub.s32 %s619_s18, %s690_s24 }
   0xd   : > { %p700_p9 = scmp.eq.s32.totalorder %s86_s26, 0  ;;  %s89_s28 = sadd.s32 1, %s615_s17 }
   0xe   : > { %p694_p8 = pnand %p432_p7, %p818_p1  ;;  %p96_p10 = scmp.ne.s32.totalorder %s615_s17, %s611_s16 }
   0xf   : > { %s510_s29 = scalar_lea.vmem %s154_s23, 128  ;;  %p518_p2 = scmp.lt.s32.totalorder %s154_s23, %s154_s23 }
  0x10   : > { %p501_p11 = pneg %p694_p8  ;;  %p511_p12 = scmp.ne.s32.totalorder %s154_s23, %s510_s29 }
  0x11   : > { %p519_p3 = scmp.lt.s32.totalorder %s510_s29, %s510_s29 }
  0x12   : > { %p513_p13 = pnand %p511_p12, %p501_p11 }
  0x13   : > { %p520_p7 = por %p519_p3, %p518_p2 }
  0x14   : > { %p514_p0 = pneg %p513_p13 }
  0x16   : > { %p521_p4 = pnand %p520_p7, %p514_p0 }
  0x18   : > { %524 = shalt.err (!%p521_p4)
}
  0x19   : > { %435 = dma.hbm_to_vmem [thread:$0]  (!%p694_p8), %s815_s2, 128, %s154_s23, [#allocation7]  }
  0x1a   : > { %s717_s6 = scalar_select %p700_p9, %s615_s17, %s89_s28  }
  0x1b   : > { %p97_p11 = scmp.eq.s32.totalorder %s619_s18, 0  ;;  %p441_p12 = scmp.lt.s32.totalorder %s619_s18, 3 }
  0x1c   : > { %s164_s7 = sand.u32 1, %s615_s17   ;;  %s412_s8 = sshll.u32 %s619_s18, 7 }
  0x1d   : > { %p98_p4 = por %p97_p11, %p96_p10  ;;  %s411_s9 = sshll.u32 %s164_s7, 3 }
  0x1e   : > { %s729_s12 = scalar_lea.hbm %s816_s3, %s412_s8  ;;  %s168_s14 = scalar_lea.vmem [#allocation9], %s411_s9 }
  0x1f   : > { %p731_p13 = pnand %p441_p12, %p98_p4  ;;  %s175_s15 = sshll.u32 %s168_s14, 4  ;;  %s176_s15 = int_to_ptr.vmem [resolvable:$true] %s175_s15 }
  0x20   : > { %s165_s18 = scalar_lea.sflag [#allocation10], %s164_s7  ;;  %s525_s22 = scalar_lea.hbm %s729_s12, 128 }
  0x21   : > { %p526_p8 = scmp.ne.s32.totalorder %s729_s12, %s525_s22  ;;  %p527_p9 = pneg %p731_p13 }
  0x22   : > { %s530_s26 = scalar_lea.hbm %s816_s3, 384  ;;  %p531_p2 = scmp.lt.s32.totalorder %s729_s12, %s816_s3 }
  0x23   : > { %p528_p10 = pnand %p527_p9, %p526_p8  ;;  %p532_p3 = scmp.lt.s32.totalorder %s530_s26, %s525_s22 }
  0x25   : > { %p529_p0 = pneg %p528_p10  ;;  %p533_p7 = por %p532_p3, %p531_p2 }
  0x27   : > { %p534_p11 = pnand %p533_p7, %p529_p0 }
  0x29   : > { %537 = shalt.err (!%p534_p11)
}
  0x2a   : > { %s538_s29 = scalar_lea.vmem %s176_s15, 128  ;;  %s622_s30 = smov [#allocation9]  }
  0x2b   : > { %p539_p12 = scmp.ne.s32.totalorder %s176_s15, %s538_s29  ;;  %s543_s5 = sshll.u32 %s622_s30, 4  ;;  %s544_s5 = int_to_ptr.vmem [resolvable:$false] %s543_s5 }
  0x2c   : > { %s545_s7 = scalar_lea.vmem %s544_s5, 256  ;;  %p546_p8 = scmp.lt.s32.totalorder %s176_s15, %s544_s5 }
  0x2d   : > { %p541_p4 = pnand %p539_p12, %p527_p9  ;;  %p547_p10 = scmp.lt.s32.totalorder %s545_s7, %s538_s29 }
  0x2f   : > { %p542_p1 = pneg %p541_p4  ;;  %p548_p5 = por %p547_p10, %p546_p8 }
  0x31   : > { %p549_p6 = pnand %p548_p5, %p542_p1 }
  0x33   : > { %552 = shalt.err (!%p549_p6)
}
  0x34   : > { %439 = dma.hbm_to_vmem [thread:$0]  (!%p731_p13), %s729_s12, 128, %s176_s15, %s165_s18  }
  0x35   : > { %p826_p0 = scmp.ne.s32.totalorder %s822_s21, 0 }
  0x36   : > { %p827_p2 = scmp.eq.s32.totalorder (!%p826_p0), %s670_s19, 0 }
  0x37   : > { %184 = sbr.rel (%p826_p0) target bundleno = 1055 (0x41f), region = 36 }
  0x3c   : > { %594 = dma.done.wait (%p827_p2), [#allocation7], 128   ;;  %p828_p9 = pmov %p827_p2 }
  0x3d   : > { %s190_s8 = sand.u32 1, %s611_s16   ;;  %p829_p1 = scmp.ne.s32.totalorder %s821_s20, 0 }
  0x3e   : > { %596 = vsyncadd (%p828_p9), [#allocation7], 4294967168  ;;  %s756_s9 = sshll.u32 %s190_s8, 3  ;;  %s191_s10 = scalar_lea.sflag [#allocation10], %s190_s8 }
  0x3f   : > { %s194_s11 = scalar_lea.vmem [#allocation9], %s756_s9 }
  0x40   : > { %598 = dma.done.wait (%p829_p1), %s191_s10, 128  }
  0x41   : > { %600 = vsyncadd (%p829_p1), %s191_s10, 4294967168  ;;  %p830_p5 = scmp.ne.s32.totalorder %s670_s19, 0 }
  0x43   : > { %217 = sbr.rel (%p830_p5) target bundleno = 549 (0x225), region = 48 }
  0x48   : > { %v218_v0 = vld [vmem:[%s814_s1] sm:$0xff]  ;;  %vm219_vm0 = vcmask 130048   ;;  %v247_v1 = vld [vmem:[#allocation6] sm:$0xff]  ;;  %vm245_vm1 = vcmask 0   ;;  %v623_v14 = vmov 0.0  }
  0x49   : > { %v220_v2 = vsel %vm219_vm0, %v218_v0, -inf  ;;  %v248_v3 = vsel %vm219_vm0, %v247_v1, -inf  ;;  %275 = vst.msk [vmem:[#allocation5] sm:$0x1] %vm245_vm1, %v623_v14 }
  0x4a   : > { %221 = vmax.xlane.f32.xlu0 %v220_v2 }
  0x4e   : > { %249 = vmax.xlane.f32.xlu0 %v248_v3 }
  0xd3   : > { %v222_v4 = vpop.xlane.xlu0 %221 }
  0xd4   : > { %v223_v5 = vsub.f32 %v218_v0, %v222_v4 }
  0xd6   : > { %v224_v6 = vmul.f32 1.442695, %v223_v5 }
  0xd7   : > { %v250_v7 = vpop.xlane.xlu0 %249 }
  0xd8   : > { %481 = vpow2.f32 %v224_v6  ;;  %v251_v8 = vsub.f32 %v247_v1, %v250_v7 }
  0xda   : > { %v252_v9 = vmul.f32 1.442695, %v251_v8 }
  0xdc   : > { %483 = vpow2.f32 %v252_v9 }
  0xe5   : > { %v482_v10 = vpop.eup %481 }
  0xe6   : > { %v226_v11 = vsel %vm219_vm0, %v482_v10, 0.0 }
  0xe7   : > { %227 = vadd.xlane.f32.xlu1 %v226_v11 }
  0xe9   : > { %v484_v12 = vpop.eup %483 }
  0xea   : > { %v254_v13 = vsel %vm219_vm0, %v484_v12, 0.0 }
  0xeb   : > { %255 = vadd.xlane.f32.xlu1 %v254_v13 }
 0x170   : > { %v228_v15 = vpop.xlane.xlu1 %227 }
 0x171   : > { %485 = vlog2.f32 %v228_v15 }
 0x172   : > { %487 = vrcp.f32 %v228_v15 }
 0x174   : > { %v256_v16 = vpop.xlane.xlu1 %255 }
 0x175   : > { %489 = vlog2.f32 %v256_v16 }
 0x176   : > { %491 = vrcp.f32 %v256_v16 }
 0x17e   : > { %v486_v17 = vpop.eup %485 }
 0x17f   : > { %v488_v18 = vpop.eup %487  ;;  %v230_v19 = vmul.f32 0.6931472, %v486_v17 }
 0x180   : > { %v232_v20 = vmul.f32 %v488_v18, %v482_v10 }
 0x181   : > { %v233_v21 = vsub.f32 %v223_v5, %v230_v19 }
 0x182   : > { %234 = vst.msk [vmem:[#allocation2] sm:$0xff] %vm219_vm0, %v232_v20  ;;  %v490_v22 = vpop.eup %489 }
 0x183   : > { %v235_v23 = vmul.f32 %v233_v21, %v232_v20  ;;  %v260_v24 = vmul.f32 0.6931472, %v490_v22  ;;  %v492_v25 = vpop.eup %491 }
 0x184   : > { %v258_v28 = vmul.f32 %v492_v25, %v484_v12 }
 0x185   : > { %v236_v26 = vsel %vm219_vm0, %v235_v23, 0.0  ;;  %v261_v27 = vsub.f32 %v251_v8, %v260_v24 }
 0x186   : > { %237 = vadd.xlane.f32.xlu1 %v236_v26 }
 0x187   : > { %v262_v29 = vsub.f32 %v261_v27, %v233_v21 }
 0x189   : > { %v263_v30 = vmul.f32 %v262_v29, %v258_v28 }
 0x18b   : > { %v264_v31 = vsel %vm219_vm0, %v263_v30, 0.0 }
 0x18c   : > { %265 = vadd.xlane.f32.xlu0 %v264_v31 }
 0x20f   : > { %v238_v32 = vpop.xlane.xlu1 %237 }
 0x210   : > { %v239_v33 = vrot.slane %v238_v32, 4 }
 0x212   : > { %v240_v34 = vadd.f32 %v239_v33, %v238_v32 }
 0x214   : > { %v241_v35 = vrot.slane %v240_v34, 2 }
 0x215   : > { %v266_v37 = vpop.xlane.xlu0 %265 }
 0x216   : > { %v242_v36 = vadd.f32 %v241_v35, %v240_v34  ;;  %v267_v38 = vrot.slane %v266_v37, 4 }
 0x218   : > { %v243_v39 = vrot.slane %v242_v36, 1  ;;  %v268_v40 = vadd.f32 %v267_v38, %v266_v37 }
 0x21a   : > { %v244_v41 = vadd.f32 %v243_v39, %v242_v36  ;;  %v269_v42 = vrot.slane %v268_v40, 2 }
 0x21c   : > { %246 = vst.msk [vmem:[#allocation3] sm:$0x1] %vm245_vm1, %v244_v41  ;;  %v270_v43 = vadd.f32 %v269_v42, %v268_v40 }
 0x21e   : > { %v271_v44 = vrot.slane %v270_v43, 1 }
 0x220   : > { %v272_v45 = vadd.f32 %v271_v44, %v270_v43 }
 0x222   : > { %v273_v46 = vmul.f32 0.125, %v272_v45 }
 0x224   : > { %274 = vst.msk [vmem:[#allocation4] sm:$0x1] %vm245_vm1, %v273_v46 }
 0x225 PF: > { %v276_v47 = vld [vmem:[%s194_s11] sm:$0xff]  ;;  %vm277_vm2 = vcmask 130048   ;;  %v624_v50 = vmov 0   ;;  %v290_v51 = vlaneseq  ;;  %v321_v18 = vld [vmem:[#allocation3] sm:$0x1]  ;;  %vm327_vm4 = vcmask 0  }
 0x226   : > { %v292_v48 = vld [vmem:[%s813_s0] sm:$0xff]  ;;  %v278_v49 = vsel %vm277_vm2, %v276_v47, -inf  ;;  %493 = vset.pattern.permute.xlu1 %v624_v50  ;;  %494 = vset.pattern.permute.xlu0 %v624_v50  ;;  %v325_v24 = vld [vmem:[#allocation5] sm:$0x1]  ;;  %p417_p6 = scmp.ne.s32.totalorder %s670_s19, 2 }
 0x227   : > { %279 = vmax.xlane.f32.xlu0 %v278_v49  ;;  %294 = vperm.xlu1 %493, %v292_v48   ;;  %v291_v52 = vand.u32 127, %v290_v51  ;;  %v309_v1 = vld [vmem:[#allocation2] sm:$0xff] }
 0x2a2   : > { %v295_v53 = vpop.permute.xlu1 %294 }
 0x2a3   : > { %vm296_vm3 = vcmp.eq.s32.totalorder %v291_v52, %v295_v53 }
 0x2a4   : > { %v297_v54 = vsel %vm296_vm3, %v276_v47, 0.0 }
 0x2a5   : > { %v298_v55 = vsel %vm277_vm2, %v297_v54, 0.0 }
 0x2a6   : > { %299 = vadd.xlane.f32.xlu1 %v298_v55 }
 0x2b0   : > { %v280_v56 = vpop.xlane.xlu0 %279 }
 0x2b1   : > { %v281_v57 = vsub.f32 %v276_v47, %v280_v56 }
 0x2b3   : > { %v282_v58 = vmul.f32 1.442695, %v281_v57 }
 0x2b5   : > { %495 = vpow2.f32 %v282_v58 }
 0x2c2   : > { %v496_v59 = vpop.eup %495 }
 0x2c3   : > { %v284_v60 = vsel %vm277_vm2, %v496_v59, 0.0 }
 0x2c4   : > { %285 = vadd.xlane.f32.xlu0 %v284_v60 }
 0x32f   : > { %v300_v5 = vpop.xlane.xlu1 %299 }
 0x34d   : > { %v286_v61 = vpop.xlane.xlu0 %285 }
 0x34e   : > { %497 = vlog2.f32 %v286_v61 }
 0x35b   : > { %v498_v62 = vpop.eup %497 }
 0x35c   : > { %v288_v63 = vmul.f32 0.6931472, %v498_v62 }
 0x35e   : > { %v289_v0 = vadd.f32 %v288_v63, %v280_v56 }
 0x360   : > { %v308_v2 = vsub.f32 %v276_v47, %v289_v0  ;;  %v301_v6 = vsub.f32 %v289_v0, %v300_v5 }
 0x362   : > { %v310_v3 = vmul.f32 %v309_v1, %v308_v2  ;;  %v302_v7 = vrot.slane %v301_v6, 4 }
 0x364   : > { %v311_v4 = vsel %vm277_vm2, %v310_v3, 0.0  ;;  %v303_v8 = vadd.f32 %v302_v7, %v301_v6 }
 0x365   : > { %312 = vadd.xlane.f32.xlu0 %v311_v4 }
 0x366   : > { %v304_v9 = vrot.slane %v303_v8, 2 }
 0x368   : > { %v305_v12 = vadd.f32 %v304_v9, %v303_v8 }
 0x36a   : > { %v306_v15 = vrot.slane %v305_v12, 1 }
 0x36c   : > { %v307_v19 = vadd.f32 %v306_v15, %v305_v12 }
 0x36e   : > { %v320_v22 = vmul.f32 0.125, %v307_v19 }
 0x3ee   : > { %v313_v10 = vpop.xlane.xlu0 %312 }
 0x3ef   : > { %v314_v11 = vrot.slane %v313_v10, 4 }
 0x3f1   : > { %v315_v13 = vadd.f32 %v314_v11, %v313_v10 }
 0x3f3   : > { %v316_v14 = vrot.slane %v315_v13, 2 }
 0x3f5   : > { %v317_v16 = vadd.f32 %v316_v14, %v315_v13 }
 0x3f7   : > { %v318_v17 = vrot.slane %v317_v16, 1 }
 0x3f9   : > { %v319_v20 = vadd.f32 %v318_v17, %v317_v16 }
 0x3fb   : > { %v322_v21 = vsub.f32 %v321_v18, %v319_v20 }
 0x3fd   : > { %v323_v23 = vmul.f32 -0.025, %v322_v21 }
 0x3ff   : > { %v324_v25 = vadd.f32 %v323_v23, %v320_v22  ;;  %332 = sbr.rel (%p417_p6) target bundleno = 1040 (0x410), region = 52 }
 0x401   : > { %v326_v26 = vadd.f32 %v325_v24, %v324_v25 }
 0x403   : > { %328 = vst.msk [vmem:[#allocation5] sm:$0x1] %vm327_vm4, %v326_v26 }
 0x404   : > { %v334_v28 = vld [vmem:[#allocation4] sm:$0x1] }
 0x40a   : > { %v333_v27 = vld [vmem:[#allocation5] sm:$0x1] }
 0x40b   : > { %v335_v29 = vadd.f32 %v334_v28, %v333_v27 }
 0x40d   : > { %v336_v30 = vmul.f32 3.0, %v335_v29 }
 0x40f   : > { %337 = vst.msk [vmem:[#allocation11] sm:$0x1] %vm327_vm4, %v336_v30 }
 0x410 PF: > { %p443_p13 = scmp.eq.s32.totalorder %s670_s19, 2  ;;  %s625_s14 = smov [#allocation11]  }
 0x411   : > { %s345_s15 = sshll.u32 %s625_s14, 4  ;;  %s346_s15 = int_to_ptr.vmem [resolvable:$true] %s345_s15 }
 0x412   : > { %s553_s18 = scalar_lea.vmem %s346_s15, 16  ;;  %s559_s22 = scalar_lea.vmem %s346_s15, 32 }
 0x413   : > { %p554_p3 = scmp.ne.s32.totalorder %s346_s15, %s553_s18  ;;  %p560_p12 = scmp.lt.s32.totalorder %s346_s15, %s346_s15 }
 0x414   : > { %p561_p4 = scmp.lt.s32.totalorder %s559_s22, %s553_s18 }
 0x415   : > { %p555_p7 = pnand %p554_p3, %p443_p13 }
 0x416   : > { %p562_p8 = por %p561_p4, %p560_p12 }
 0x417   : > { %p556_p11 = pneg %p555_p7 }
 0x419   : > { %p563_p10 = pnand %p562_p8, %p556_p11 }
 0x41b   : > { %566 = shalt.err (!%p563_p10)
}
 0x41c   : > { %429 = dma.vmem_to_hbm [thread:$0]  (%p443_p13), %s346_s15, 16, %s817_s4, [#allocation8]  }
 0x41d   : > { %602 = dma.done.wait (%p443_p13), [#allocation8], 16  }
 0x41e   : > { %604 = vsyncadd (%p443_p13), [#allocation8], 4294967280 }
 0x41f PF: > { %p16_p0 = scmp.ge.s32.totalorder %s690_s24, 5   ;;  %s831_s15 = smov %s611_s16 }
 0x420   : > { %s832_s16 = smov %s615_s17  ;;  %s833_s17 = smov %s717_s6 }
 0x421   : > { %s834_s18 = smov %s690_s24  ;;  %18 = sbr.rel (!%p16_p0) target bundleno = 5 (0x5), region = 86 }
 0x426   :  { %358 = vsyncpa [#allocation7], 1 }
 0x427   :  { %360 = vsyncpa [#allocation7 + $0x1], 1 }
 0x428   :  { %361 = vsyncpa [#allocation10], 1 }
 0x429   :  { %363 = vsyncpa [#allocation10 + $0x1], 1 }
 0x42a   :  { %364 = vsyncpa [#allocation8], 1 }
 0x42b   :  { %366 = vsyncpa [#allocation8 + $0x1], 1 }

</bundles_post_ra>
